<compile_context>
chip_gen: v6e
topology: v6e:2x2x1
jax: 0.10.0
libtpu: 0.0.40
codegen_flags: <defaults>
</compile_context>

<pallas_src>
import math
import functools

import jax
import jax.numpy as jnp
from jax import lax
from jax.experimental import pallas as pl
from jax.experimental.pallas import tpu as pltpu


# MXU operand dtype: bf16 weights + bf16 activations into every matmul,
# f32 accumulation via preferred_element_type.  All elementwise / LayerNorm /
# softmax statistics stay f32 (also correct on v5e, which has no bf16 VPU/EUP).
_MXU_DTYPE = jnp.bfloat16

_LN_EPS = 1e-5  # torch.nn.LayerNorm default


def _layer_norm(x, gamma, beta):
    mu = jnp.mean(x, axis=-1, keepdims=True)
    xc = x - mu
    var = jnp.mean(xc * xc, axis=-1, keepdims=True)
    return xc * lax.rsqrt(var + _LN_EPS) * gamma + beta


def _encoder_kernel(x_ref, wqkv_ref, wo_ref, w1_ref, w2_ref, vecs_ref,
                    o_ref, heads_ref, *, h, d_k, d_v, d_model, d_ff):
    """One grid point = (batch block b, layer l).

    x_ref    : (Bt, S, d_model) f32           input activations, batch block b
    wqkv_ref : (1, d_model, h*(2dk+dv)) bf16  layer-l fused Q|K|V projection
    wo_ref   : (1, h*d_v, d_model) bf16       layer-l output projection
    w1_ref   : (1, d_model, d_ff)  bf16       layer-l FFN up projection
    w2_ref   : (1, d_ff, d_model)  bf16       layer-l FFN down projection
    vecs_ref : (1, 8, max(d_ff,d_model)) f32  rows = [b1, b2, g1, be1, g2, be2, 0, 0]
    o_ref    : (Bt, S, d_model) f32           output block, resident across the
               layer axis; holds the running activations (flushed when the
               batch block advances).
    heads_ref: (Bt*S, h*d_v) bf16 scratch     per-head attention outputs, so the
               output projection is a single deep (K = h*d_v) matmul.
    """
    l = pl.program_id(1)

    # Layer 0: seed the resident output block with the input activations.
    @pl.when(l == 0)
    def _():
        o_ref[...] = x_ref[...]

    Bt, S = o_ref.shape[0], o_ref.shape[1]
    M = Bt * S

    x = o_ref[...].reshape(M, d_model)                  # (M, d_model) f32

    wqkv = wqkv_ref[0]                                  # bf16, streamed per layer
    wo = wo_ref[0]
    w1 = w1_ref[0]
    w2 = w2_ref[0]
    vecs = vecs_ref[0]                                  # (8, d_pad) f32
    b1 = vecs[0:1, :d_ff]
    b2 = vecs[1:2, :d_model]
    g1 = vecs[2:3, :d_model]
    be1 = vecs[3:4, :d_model]
    g2 = vecs[4:5, :d_model]
    be2 = vecs[5:6, :d_model]

    # ------------------------- Multi-head attention -------------------------
    # Single fused wide bf16 MXU matmul for all heads' Q|K|V (f32 accumulation).
    qkv = jnp.dot(x.astype(_MXU_DTYPE), wqkv,
                  preferred_element_type=jnp.float32)   # (M, h*(2dk+dv)) f32
    qkv = qkv.reshape(Bt, S, -1)

    scale = 1.0 / math.sqrt(d_k)
    k_off = h * d_k
    v_off = 2 * h * d_k
    # TODO(synk): for h > ~4 convert to lax.fori_loop to bound live vreg state;
    # pad each head slab to a 128-lane boundary at production d_k/d_v.
    for i in range(h):                                  # static, unrolled (h=4)
        q_h = qkv[:, :, i * d_k:(i + 1) * d_k] * scale              # (Bt,S,d_k)
        k_h = qkv[:, :, k_off + i * d_k:k_off + (i + 1) * d_k]      # (Bt,S,d_k)
        v_h = qkv[:, :, v_off + i * d_v:v_off + (i + 1) * d_v]      # (Bt,S,d_v)

        # q @ k^T without materializing a transpose; softmax stats in f32.
        s = jnp.einsum("bqd,bkd->bqk", q_h.astype(_MXU_DTYPE),
                       k_h.astype(_MXU_DTYPE),
                       preferred_element_type=jnp.float32)          # (Bt,S,S)
        s = s - jnp.max(s, axis=-1, keepdims=True)
        p = jnp.exp(s)
        attn = p * pl.reciprocal(jnp.sum(p, axis=-1, keepdims=True),
                                 approx=True)
        head = jnp.einsum("bqk,bkd->bqd", attn.astype(_MXU_DTYPE),
                          v_h.astype(_MXU_DTYPE),
                          preferred_element_type=jnp.float32)       # (Bt,S,d_v)

        # Stash each head in VMEM; the output projection then runs as ONE
        # matmul with contraction depth h*d_v instead of h thin K=d_v matmuls.
        heads_ref[:, i * d_v:(i + 1) * d_v] = (
            head.reshape(M, d_v).astype(heads_ref.dtype))

    mha = jnp.dot(heads_ref[...], wo,
                  preferred_element_type=jnp.float32)               # (M, d_model)

    # TODO(synk): nn.Dropout(0.1) is treated as identity (inference semantics).
    y = _layer_norm(mha + x, g1, be1)

    # ------------------------------ Feed-forward ------------------------------
    hdn = jnp.maximum(
        jnp.dot(y.astype(_MXU_DTYPE), w1, preferred_element_type=jnp.float32)
        + b1, 0.0)
    ffn = jnp.dot(hdn.astype(_MXU_DTYPE), w2,
                  preferred_element_type=jnp.float32) + b2

    # Write the new running state back into the resident output block.
    o_ref[...] = _layer_norm(ffn + y, g2, be2).reshape(Bt, S, d_model)


def encoder_forward(x, wqkv, wo, w1, w2, vecs, *, h, d_k, d_v, batch_block=1):
    """x: (B, S, d_model) f32.  Weight stacks have a leading n_layer axis:
    wqkv/wo/w1/w2 in bf16, vecs = packed [b1,b2,g1,be1,g2,be2] rows in f32."""
    B, S, d_model = x.shape
    n_layer, _, n_qkv = wqkv.shape
    d_ff = w1.shape[-1]
    d_pad = vecs.shape[-1]
    Bt = batch_block
    assert B % Bt == 0, "batch_block must divide the batch size"

    kernel = functools.partial(_encoder_kernel, h=h, d_k=d_k, d_v=d_v,
                               d_model=d_model, d_ff=d_ff)

    def per_layer(arr):
        # One layer's slab per grid step: streamed + double-buffered, so layer
        # l+1 weights prefetch from HBM while layer l computes; only ~2 layers
        # of weights are ever resident in VMEM.
        return pl.BlockSpec((1,) + arr.shape[1:], lambda b, l: (l, 0, 0))

    in_act_spec = pl.BlockSpec((Bt, S, d_model), lambda b, l: (b, 0, 0))
    out_act_spec = pl.BlockSpec((Bt, S, d_model), lambda b, l: (b, 0, 0))

    # Explicit VMEM budget (mandatory headroom story on v7x's 64 MiB VMEM and
    # v5e's 16 MiB default scoped limit): 2x one layer's weights (double
    # buffered) + packed LN/bias slab + activation blocks + heads scratch +
    # rough allowance for live intermediates, times 2 for safety.
    w_itemsize = wqkv.dtype.itemsize
    per_layer_w = (d_model * n_qkv + h * d_v * d_model
                   + d_model * d_ff + d_ff * d_model) * w_itemsize
    est = (2 * per_layer_w
           + 2 * 8 * d_pad * 4
           + 3 * Bt * S * d_model * 4
           + Bt * S * h * d_v * 2
           + 2 * Bt * S * (n_qkv + d_ff + S) * 4)
    vmem_limit = int(min(max(2 * est, 32 * 1024 * 1024), 64 * 1024 * 1024))

    return pl.pallas_call(
        kernel,
        out_shape=jax.ShapeDtypeStruct((B, S, d_model), jnp.float32),
        grid_spec=pltpu.PrefetchScalarGridSpec(
            num_scalar_prefetch=0,
            grid=(B // Bt, n_layer),       # batch blocks parallel, layers sequential
            in_specs=[in_act_spec, per_layer(wqkv), per_layer(wo),
                      per_layer(w1), per_layer(w2), per_layer(vecs)],
            out_specs=out_act_spec,
            scratch_shapes=[pltpu.VMEM((Bt * S, h * d_v), _MXU_DTYPE)],
        ),
        compiler_params=pltpu.CompilerParams(
            dimension_semantics=("parallel", "arbitrary"),
            vmem_limit_bytes=vmem_limit),
    )(x, wqkv, wo, w1, w2, vecs)


# --------------------------- parameter packing ---------------------------

def _xavier_uniform(key, shape):
    """Match torch.nn.init.xavier_uniform_ bounds (gain=1)."""
    if len(shape) == 2:
        fan_in, fan_out = shape[1], shape[0]
    else:
        receptive = 1
        for d in shape[2:]:
            receptive *= d
        fan_in, fan_out = shape[1] * receptive, shape[0] * receptive
    bound = math.sqrt(6.0 / (fan_in + fan_out))
    return jax.random.uniform(key, shape, jnp.float32, -bound, bound)


def init_encoder_params(key, n_layer, h, d_model, d_k, d_v, d_ff):
    layers = []
    for _ in range(n_layer):
        key, *ks = jax.random.split(key, 9)
        lim1 = 1.0 / math.sqrt(d_model)
        lim2 = 1.0 / math.sqrt(d_ff)
        layers.append(dict(
            W_Q=_xavier_uniform(ks[0], (h, d_model, d_k)),
            W_K=_xavier_uniform(ks[1], (h, d_model, d_k)),
            W_V=_xavier_uniform(ks[2], (h, d_model, d_v)),
            W_O=_xavier_uniform(ks[3], (h * d_v, d_model)),
            W1=jax.random.uniform(ks[4], (d_model, d_ff), jnp.float32, -lim1, lim1),
            b1=jax.random.uniform(ks[5], (d_ff,), jnp.float32, -lim1, lim1),
            W2=jax.random.uniform(ks[6], (d_ff, d_model), jnp.float32, -lim2, lim2),
            b2=jax.random.uniform(ks[7], (d_model,), jnp.float32, -lim2, lim2),
            g1=jnp.ones((d_model,), jnp.float32),
            be1=jnp.zeros((d_model,), jnp.float32),
            g2=jnp.ones((d_model,), jnp.float32),
            be2=jnp.zeros((d_model,), jnp.float32),
        ))
    return layers


def pack_params(layers, h, d_model, d_k, d_v, d_ff, weight_dtype=jnp.bfloat16):
    """Stack per-layer params; fuse W_Q|W_K|W_V into one wide projection; cast
    the big matrices to bf16 for HBM storage; pack the six small per-layer
    vectors into one (n_layer, 8, max(d_ff, d_model)) f32 slab."""
    def fuse_qkv(p):
        fq = jnp.transpose(p["W_Q"], (1, 0, 2)).reshape(d_model, h * d_k)
        fk = jnp.transpose(p["W_K"], (1, 0, 2)).reshape(d_model, h * d_k)
        fv = jnp.transpose(p["W_V"], (1, 0, 2)).reshape(d_model, h * d_v)
        return jnp.concatenate([fq, fk, fv], axis=-1)   # (d_model, h*(2dk+dv))

    wqkv = jnp.stack([fuse_qkv(p) for p in layers]).astype(weight_dtype)
    wo = jnp.stack([p["W_O"] for p in layers]).astype(weight_dtype)
    w1 = jnp.stack([p["W1"] for p in layers]).astype(weight_dtype)
    w2 = jnp.stack([p["W2"] for p in layers]).astype(weight_dtype)

    d_pad = max(d_ff, d_model)

    def row(v):
        return jnp.pad(v.astype(jnp.float32), (0, d_pad - v.shape[0]))

    zero = jnp.zeros((d_pad,), jnp.float32)
    vecs = jnp.stack([
        jnp.stack([row(p["b1"]), row(p["b2"]), row(p["g1"]), row(p["be1"]),
                   row(p["g2"]), row(p["be2"]), zero, zero])
        for p in layers])                               # (n_layer, 8, d_pad) f32
    return wqkv, wo, w1, w2, vecs


# --------------------------- references (host) ---------------------------

def _reference_encoder(x, layers):
    """Pure-f32 JAX reference mirroring the PyTorch Encoder.forward (eval mode)."""
    def ln(v, g, b):
        mu = v.mean(axis=-1, keepdims=True)
        var = ((v - mu) ** 2).mean(axis=-1, keepdims=True)
        return (v - mu) / jnp.sqrt(var + _LN_EPS) * g + b

    for p in layers:
        h = p["W_Q"].shape[0]
        d_k = p["W_Q"].shape[-1]
        heads = []
        for i in range(h):
            q = x @ p["W_Q"][i]
            k = x @ p["W_K"][i]
            v = x @ p["W_V"][i]
            s = q @ jnp.swapaxes(k, -1, -2) / math.sqrt(d_k)
            heads.append(jax.nn.softmax(s, axis=-1) @ v)
        mha = jnp.concatenate(heads, axis=-1) @ p["W_O"]
        y = ln(mha + x, p["g1"], p["be1"])
        ffn = jnp.maximum(y @ p["W1"] + p["b1"], 0.0) @ p["W2"] + p["b2"]
        x = ln(ffn + y, p["g2"], p["be2"])
    return x


def _reference_encoder_mixed(x, layers):
    """Reference mirroring the kernel's precision: bf16 weights + bf16 matmul
    inputs, f32 accumulation, f32 LayerNorm/softmax stats and residuals."""
    bf = jnp.bfloat16

    def ln(v, g, b):
        mu = v.mean(axis=-1, keepdims=True)
        var = ((v - mu) ** 2).mean(axis=-1, keepdims=True)
        return (v - mu) / jnp.sqrt(var + _LN_EPS) * g + b

    def mm(a, w):
        return jnp.dot(a.astype(bf), w.astype(bf),
                       preferred_element_type=jnp.float32)

    for p in layers:
        h = p["W_Q"].shape[0]
        d_k = p["W_Q"].shape[-1]
        heads = []
        for i in range(h):
            q = mm(x, p["W_Q"][i]) / math.sqrt(d_k)
            k = mm(x, p["W_K"][i])
            v = mm(x, p["W_V"][i])
            s = jnp.einsum("bqd,bkd->bqk", q.astype(bf), k.astype(bf),
                           preferred_element_type=jnp.float32)
            pr = jax.nn.softmax(s, axis=-1)
            heads.append(jnp.einsum("bqk,bkd->bqd", pr.astype(bf), v.astype(bf),
                                    preferred_element_type=jnp.float32))
        mha = mm(jnp.concatenate(heads, axis=-1), p["W_O"])
        y = ln(mha + x, p["g1"], p["be1"])
        hdn = jnp.maximum(mm(y, p["W1"]) + p["b1"], 0.0)
        ffn = mm(hdn, p["W2"]) + p["b2"]
        x = ln(ffn + y, p["g2"], p["be2"])
    return x


if __name__ == "__main__":
    # Small shapes consistent with the module.
    n_layer, h, d_model, d_k, d_v, d_ff = 2, 4, 32, 16, 16, 64
    B, S = 2, 8

    root = jax.random.PRNGKey(0)
    kx, kp = jax.random.split(root)
    x = jax.random.normal(kx, (B, S, d_model), jnp.float32)

    layers = init_encoder_params(kp, n_layer, h, d_model, d_k, d_v, d_ff)
    packed = pack_params(layers, h, d_model, d_k, d_v, d_ff)

    ref_mixed = _reference_encoder_mixed(x, layers)   # kernel-precision reference
    ref_f32 = _reference_encoder(x, layers)           # PyTorch-equivalent f32 ref

    # Bt=1 keeps a parallel batch axis of 2 (megacore); Bt=2 amortizes the
    # per-batch weight re-DMA by flattening the matmul M dimension to Bt*S.
    for Bt in (1, 2):
        out = encoder_forward(x, *packed, h=h, d_k=d_k, d_v=d_v, batch_block=Bt)
        out = jax.block_until_ready(out)
        assert out.shape == (B, S, d_model)

        err_mixed = float(jnp.max(jnp.abs(out - ref_mixed)))
        assert jnp.allclose(out, ref_mixed, atol=2e-2, rtol=2e-2), \
            f"Bt={Bt} max abs err vs mixed-precision ref = {err_mixed}"

        # Broad semantic sanity vs the full-f32 PyTorch-equivalent math
        # (difference here is the deliberate bf16 weight/activation storage).
        err_f32 = float(jnp.max(jnp.abs(out - ref_f32)))
        assert err_f32 < 0.3, f"Bt={Bt} max abs err vs f32 ref = {err_f32}"

    print("KERNEL_OK")
</pallas_src>

<mosaic_0001>
module attributes {stable_mosaic.version = 11 : i64} {
  func.func @_encoder_kernel(%arg0: i32, %arg1: i32, %arg2: memref<1x8x32xf32, #tpu.memory_space<vmem>>, %arg3: memref<1x32x192xbf16, #tpu.memory_space<vmem>>, %arg4: memref<1x64x32xbf16, #tpu.memory_space<vmem>>, %arg5: memref<1x32x64xbf16, #tpu.memory_space<vmem>>, %arg6: memref<1x64x32xbf16, #tpu.memory_space<vmem>>, %arg7: memref<1x8x64xf32, #tpu.memory_space<vmem>>, %arg8: memref<1x8x32xf32, #tpu.memory_space<vmem>>, %arg9: memref<8x64xbf16, #tpu.memory_space<vmem>>) attributes {dimension_semantics = [#tpu.dimension_semantics<parallel>, #tpu.dimension_semantics<arbitrary>], iteration_bounds = array<i64: 2, 2>, scalar_prefetch = 0 : i64, scratch_operands = 1 : i64, tpu.core_type = #tpu.core_type<tc>, window_params = [{transform_indices = @transform_0, window_bounds = array<i64: 1, 8, 32>}, {transform_indices = @transform_1, window_bounds = array<i64: 1, 32, 192>}, {transform_indices = @transform_2, window_bounds = array<i64: 1, 64, 32>}, {transform_indices = @transform_3, window_bounds = array<i64: 1, 32, 64>}, {transform_indices = @transform_4, window_bounds = array<i64: 1, 64, 32>}, {transform_indices = @transform_5, window_bounds = array<i64: 1, 8, 64>}, {transform_indices = @transform_6, window_bounds = array<i64: 1, 8, 32>}]} {
    %c0_i32 = arith.constant 0 : i32
    %0 = arith.cmpi eq, %arg1, %c0_i32 : i32
    %1 = arith.extui %0 : i1 to i32
    %c0_i32_0 = arith.constant 0 : i32
    %2 = arith.cmpi ne, %1, %c0_i32_0 : i32
    scf.if %2 {
      %c0_62 = arith.constant 0 : index
      %c0_63 = arith.constant 0 : index
      %c0_64 = arith.constant 0 : index
      %176 = vector.load %arg2[%c0_62, %c0_63, %c0_64] : memref<1x8x32xf32, #tpu.memory_space<vmem>>, vector<1x8x32xf32>
      %c0_65 = arith.constant 0 : index
      %c0_66 = arith.constant 0 : index
      %c0_67 = arith.constant 0 : index
      %177 = vector.load %arg8[%c0_65, %c0_66, %c0_67] : memref<1x8x32xf32, #tpu.memory_space<vmem>>, vector<1x8x32xf32>
      tpu.vector_store %arg8[%c0_65, %c0_66, %c0_67], %176 {strides = array<i32>} : memref<1x8x32xf32, #tpu.memory_space<vmem>>, vector<1x8x32xf32>,
    } else {
    }
    %c0 = arith.constant 0 : index
    %c0_1 = arith.constant 0 : index
    %c0_2 = arith.constant 0 : index
    %3 = vector.load %arg8[%c0, %c0_1, %c0_2] : memref<1x8x32xf32, #tpu.memory_space<vmem>>, vector<1x8x32xf32>
    %4 = vector.shape_cast %3 : vector<1x8x32xf32> to vector<8x32xf32>
    %c0_3 = arith.constant 0 : index
    %c0_4 = arith.constant 0 : index
    %c0_5 = arith.constant 0 : index
    %5 = vector.load %arg3[%c0_3, %c0_4, %c0_5] : memref<1x32x192xbf16, #tpu.memory_space<vmem>>, vector<1x32x192xbf16>
    %6 = vector.shape_cast %5 : vector<1x32x192xbf16> to vector<32x192xbf16>
    %c0_6 = arith.constant 0 : index
    %c0_7 = arith.constant 0 : index
    %c0_8 = arith.constant 0 : index
    %7 = vector.load %arg4[%c0_6, %c0_7, %c0_8] : memref<1x64x32xbf16, #tpu.memory_space<vmem>>, vector<1x64x32xbf16>
    %8 = vector.shape_cast %7 : vector<1x64x32xbf16> to vector<64x32xbf16>
    %c0_9 = arith.constant 0 : index
    %c0_10 = arith.constant 0 : index
    %c0_11 = arith.constant 0 : index
    %9 = vector.load %arg5[%c0_9, %c0_10, %c0_11] : memref<1x32x64xbf16, #tpu.memory_space<vmem>>, vector<1x32x64xbf16>
    %10 = vector.shape_cast %9 : vector<1x32x64xbf16> to vector<32x64xbf16>
    %c0_12 = arith.constant 0 : index
    %c0_13 = arith.constant 0 : index
    %c0_14 = arith.constant 0 : index
    %11 = vector.load %arg6[%c0_12, %c0_13, %c0_14] : memref<1x64x32xbf16, #tpu.memory_space<vmem>>, vector<1x64x32xbf16>
    %12 = vector.shape_cast %11 : vector<1x64x32xbf16> to vector<64x32xbf16>
    %c0_15 = arith.constant 0 : index
    %c0_16 = arith.constant 0 : index
    %c0_17 = arith.constant 0 : index
    %13 = vector.load %arg7[%c0_15, %c0_16, %c0_17] : memref<1x8x64xf32, #tpu.memory_space<vmem>>, vector<1x8x64xf32>
    %14 = vector.shape_cast %13 : vector<1x8x64xf32> to vector<8x64xf32>
    %15 = vector.extract_strided_slice %14 {offsets = [0, 0], sizes = [1, 64], strides = [1, 1]} : vector<8x64xf32> to vector<1x64xf32>
    %16 = vector.extract_strided_slice %14 {offsets = [1, 0], sizes = [1, 32], strides = [1, 1]} : vector<8x64xf32> to vector<1x32xf32>
    %17 = vector.extract_strided_slice %14 {offsets = [2, 0], sizes = [1, 32], strides = [1, 1]} : vector<8x64xf32> to vector<1x32xf32>
    %18 = vector.extract_strided_slice %14 {offsets = [3, 0], sizes = [1, 32], strides = [1, 1]} : vector<8x64xf32> to vector<1x32xf32>
    %19 = vector.extract_strided_slice %14 {offsets = [4, 0], sizes = [1, 32], strides = [1, 1]} : vector<8x64xf32> to vector<1x32xf32>
    %20 = vector.extract_strided_slice %14 {offsets = [5, 0], sizes = [1, 32], strides = [1, 1]} : vector<8x64xf32> to vector<1x32xf32>
    %21 = arith.truncf %4 : vector<8x32xf32> to vector<8x32xbf16>
    %cst = arith.constant dense<0.000000e+00> : vector<8x192xf32>
    %22 = tpu.matmul %21, %6, %cst {dimension_numbers = #tpu.dot_dimension_numbers<[1], [0], [0], [1], [0, 0, 1, 1], [], []>} : vector<8x32xbf16>, vector<32x192xbf16>, vector<8x192xf32> -> vector<8x192xf32>
    %23 = vector.shape_cast %22 : vector<8x192xf32> to vector<1x8x192xf32>
    %24 = vector.extract_strided_slice %23 {offsets = [0, 0, 0], sizes = [1, 8, 16], strides = [1, 1, 1]} : vector<1x8x192xf32> to vector<1x8x16xf32>
    %cst_18 = arith.constant 2.500000e-01 : f32
    %25 = vector.broadcast %cst_18 : f32 to vector<1x8x16xf32>
    %26 = arith.mulf %24, %25 : vector<1x8x16xf32>
    %27 = vector.extract_strided_slice %23 {offsets = [0, 0, 64], sizes = [1, 8, 16], strides = [1, 1, 1]} : vector<1x8x192xf32> to vector<1x8x16xf32>
    %28 = vector.extract_strided_slice %23 {offsets = [0, 0, 128], sizes = [1, 8, 16], strides = [1, 1, 1]} : vector<1x8x192xf32> to vector<1x8x16xf32>
    %29 = arith.truncf %26 : vector<1x8x16xf32> to vector<1x8x16xbf16>
    %30 = arith.truncf %27 : vector<1x8x16xf32> to vector<1x8x16xbf16>
    "tpu.trace_start"() <{level = 10 : i32, message = "bqd,bkd->bqk"}> : () -> ()
    %cst_19 = arith.constant dense<0.000000e+00> : vector<1x8x8xf32>
    %31 = tpu.matmul %29, %30, %cst_19 {dimension_numbers = #tpu.dot_dimension_numbers<[2], [2], [1], [1], [0, 0, 0, 1, 1, 1], [0], [0]>} : vector<1x8x16xbf16>, vector<1x8x16xbf16>, vector<1x8x8xf32> -> vector<1x8x8xf32>
    "tpu.trace_stop"() : () -> ()
    %cst_20 = arith.constant dense<0xFF800000> : vector<1x8xf32>
    %32 = vector.multi_reduction <maximumf>, %31, %cst_20 [2] : vector<1x8x8xf32> to vector<1x8xf32>
    %33 = vector.shape_cast %32 : vector<1x8xf32> to vector<1x8x1xf32>
    %34 = vector.broadcast %33 : vector<1x8x1xf32> to vector<1x8x8xf32>
    %35 = arith.subf %31, %34 : vector<1x8x8xf32>
    %36 = math.exp %35 : vector<1x8x8xf32>
    %cst_21 = arith.constant dense<0.000000e+00> : vector<1x8xf32>
    %37 = vector.multi_reduction <add>, %36, %cst_21 [2] : vector<1x8x8xf32> to vector<1x8xf32>
    %38 = vector.shape_cast %37 : vector<1x8xf32> to vector<1x8x1xf32>
    %39 = tpu.reciprocal %38 {approx = true} : vector<1x8x1xf32> -> vector<1x8x1xf32>
    %40 = vector.broadcast %39 : vector<1x8x1xf32> to vector<1x8x8xf32>
    %41 = arith.mulf %36, %40 : vector<1x8x8xf32>
    %42 = arith.truncf %41 : vector<1x8x8xf32> to vector<1x8x8xbf16>
    %43 = arith.truncf %28 : vector<1x8x16xf32> to vector<1x8x16xbf16>
    "tpu.trace_start"() <{level = 10 : i32, message = "bqk,bkd->bqd"}> : () -> ()
    %cst_22 = arith.constant dense<0.000000e+00> : vector<1x8x16xf32>
    %44 = tpu.matmul %42, %43, %cst_22 {dimension_numbers = #tpu.dot_dimension_numbers<[2], [1], [1], [2], [0, 0, 0, 1, 1, 2], [0], [0]>} : vector<1x8x8xbf16>, vector<1x8x16xbf16>, vector<1x8x16xf32> -> vector<1x8x16xf32>
    "tpu.trace_stop"() : () -> ()
    %45 = vector.shape_cast %44 : vector<1x8x16xf32> to vector<8x16xf32>
    %46 = arith.truncf %45 : vector<8x16xf32> to vector<8x16xbf16>
    %c0_23 = arith.constant 0 : index
    %c0_24 = arith.constant 0 : index
    %47 = vector.load %arg9[%c0_23, %c0_24] : memref<8x64xbf16, #tpu.memory_space<vmem>>, vector<8x16xbf16>
    tpu.vector_store %arg9[%c0_23, %c0_24], %46 {strides = array<i32>} : memref<8x64xbf16, #tpu.memory_space<vmem>>, vector<8x16xbf16>,
    %48 = vector.extract_strided_slice %23 {offsets = [0, 0, 16], sizes = [1, 8, 16], strides = [1, 1, 1]} : vector<1x8x192xf32> to vector<1x8x16xf32>
    %cst_25 = arith.constant 2.500000e-01 : f32
    %49 = vector.broadcast %cst_25 : f32 to vector<1x8x16xf32>
    %50 = arith.mulf %48, %49 : vector<1x8x16xf32>
    %51 = vector.extract_strided_slice %23 {offsets = [0, 0, 80], sizes = [1, 8, 16], strides = [1, 1, 1]} : vector<1x8x192xf32> to vector<1x8x16xf32>
    %52 = vector.extract_strided_slice %23 {offsets = [0, 0, 144], sizes = [1, 8, 16], strides = [1, 1, 1]} : vector<1x8x192xf32> to vector<1x8x16xf32>
    %53 = arith.truncf %50 : vector<1x8x16xf32> to vector<1x8x16xbf16>
    %54 = arith.truncf %51 : vector<1x8x16xf32> to vector<1x8x16xbf16>
    "tpu.trace_start"() <{level = 10 : i32, message = "bqd,bkd->bqk"}> : () -> ()
    %cst_26 = arith.constant dense<0.000000e+00> : vector<1x8x8xf32>
    %55 = tpu.matmul %53, %54, %cst_26 {dimension_numbers = #tpu.dot_dimension_numbers<[2], [2], [1], [1], [0, 0, 0, 1, 1, 1], [0], [0]>} : vector<1x8x16xbf16>, vector<1x8x16xbf16>, vector<1x8x8xf32> -> vector<1x8x8xf32>
    "tpu.trace_stop"() : () -> ()
    %cst_27 = arith.constant dense<0xFF800000> : vector<1x8xf32>
    %56 = vector.multi_reduction <maximumf>, %55, %cst_27 [2] : vector<1x8x8xf32> to vector<1x8xf32>
    %57 = vector.shape_cast %56 : vector<1x8xf32> to vector<1x8x1xf32>
    %58 = vector.broadcast %57 : vector<1x8x1xf32> to vector<1x8x8xf32>
    %59 = arith.subf %55, %58 : vector<1x8x8xf32>
    %60 = math.exp %59 : vector<1x8x8xf32>
    %cst_28 = arith.constant dense<0.000000e+00> : vector<1x8xf32>
    %61 = vector.multi_reduction <add>, %60, %cst_28 [2] : vector<1x8x8xf32> to vector<1x8xf32>
    %62 = vector.shape_cast %61 : vector<1x8xf32> to vector<1x8x1xf32>
    %63 = tpu.reciprocal %62 {approx = true} : vector<1x8x1xf32> -> vector<1x8x1xf32>
    %64 = vector.broadcast %63 : vector<1x8x1xf32> to vector<1x8x8xf32>
    %65 = arith.mulf %60, %64 : vector<1x8x8xf32>
    %66 = arith.truncf %65 : vector<1x8x8xf32> to vector<1x8x8xbf16>
    %67 = arith.truncf %52 : vector<1x8x16xf32> to vector<1x8x16xbf16>
    "tpu.trace_start"() <{level = 10 : i32, message = "bqk,bkd->bqd"}> : () -> ()
    %cst_29 = arith.constant dense<0.000000e+00> : vector<1x8x16xf32>
    %68 = tpu.matmul %66, %67, %cst_29 {dimension_numbers = #tpu.dot_dimension_numbers<[2], [1], [1], [2], [0, 0, 0, 1, 1, 2], [0], [0]>} : vector<1x8x8xbf16>, vector<1x8x16xbf16>, vector<1x8x16xf32> -> vector<1x8x16xf32>
    "tpu.trace_stop"() : () -> ()
    %69 = vector.shape_cast %68 : vector<1x8x16xf32> to vector<8x16xf32>
    %70 = arith.truncf %69 : vector<8x16xf32> to vector<8x16xbf16>
    %c0_30 = arith.constant 0 : index
    %c16 = arith.constant 16 : index
    %71 = vector.load %arg9[%c0_30, %c16] : memref<8x64xbf16, #tpu.memory_space<vmem>>, vector<8x16xbf16>
    tpu.vector_store %arg9[%c0_30, %c16], %70 {strides = array<i32>} : memref<8x64xbf16, #tpu.memory_space<vmem>>, vector<8x16xbf16>,
    %72 = vector.extract_strided_slice %23 {offsets = [0, 0, 32], sizes = [1, 8, 16], strides = [1, 1, 1]} : vector<1x8x192xf32> to vector<1x8x16xf32>
    %cst_31 = arith.constant 2.500000e-01 : f32
    %73 = vector.broadcast %cst_31 : f32 to vector<1x8x16xf32>
    %74 = arith.mulf %72, %73 : vector<1x8x16xf32>
    %75 = vector.extract_strided_slice %23 {offsets = [0, 0, 96], sizes = [1, 8, 16], strides = [1, 1, 1]} : vector<1x8x192xf32> to vector<1x8x16xf32>
    %76 = vector.extract_strided_slice %23 {offsets = [0, 0, 160], sizes = [1, 8, 16], strides = [1, 1, 1]} : vector<1x8x192xf32> to vector<1x8x16xf32>
    %77 = arith.truncf %74 : vector<1x8x16xf32> to vector<1x8x16xbf16>
    %78 = arith.truncf %75 : vector<1x8x16xf32> to vector<1x8x16xbf16>
    "tpu.trace_start"() <{level = 10 : i32, message = "bqd,bkd->bqk"}> : () -> ()
    %cst_32 = arith.constant dense<0.000000e+00> : vector<1x8x8xf32>
    %79 = tpu.matmul %77, %78, %cst_32 {dimension_numbers = #tpu.dot_dimension_numbers<[2], [2], [1], [1], [0, 0, 0, 1, 1, 1], [0], [0]>} : vector<1x8x16xbf16>, vector<1x8x16xbf16>, vector<1x8x8xf32> -> vector<1x8x8xf32>
    "tpu.trace_stop"() : () -> ()
    %cst_33 = arith.constant dense<0xFF800000> : vector<1x8xf32>
    %80 = vector.multi_reduction <maximumf>, %79, %cst_33 [2] : vector<1x8x8xf32> to vector<1x8xf32>
    %81 = vector.shape_cast %80 : vector<1x8xf32> to vector<1x8x1xf32>
    %82 = vector.broadcast %81 : vector<1x8x1xf32> to vector<1x8x8xf32>
    %83 = arith.subf %79, %82 : vector<1x8x8xf32>
    %84 = math.exp %83 : vector<1x8x8xf32>
    %cst_34 = arith.constant dense<0.000000e+00> : vector<1x8xf32>
    %85 = vector.multi_reduction <add>, %84, %cst_34 [2] : vector<1x8x8xf32> to vector<1x8xf32>
    %86 = vector.shape_cast %85 : vector<1x8xf32> to vector<1x8x1xf32>
    %87 = tpu.reciprocal %86 {approx = true} : vector<1x8x1xf32> -> vector<1x8x1xf32>
    %88 = vector.broadcast %87 : vector<1x8x1xf32> to vector<1x8x8xf32>
    %89 = arith.mulf %84, %88 : vector<1x8x8xf32>
    %90 = arith.truncf %89 : vector<1x8x8xf32> to vector<1x8x8xbf16>
    %91 = arith.truncf %76 : vector<1x8x16xf32> to vector<1x8x16xbf16>
    "tpu.trace_start"() <{level = 10 : i32, message = "bqk,bkd->bqd"}> : () -> ()
    %cst_35 = arith.constant dense<0.000000e+00> : vector<1x8x16xf32>
    %92 = tpu.matmul %90, %91, %cst_35 {dimension_numbers = #tpu.dot_dimension_numbers<[2], [1], [1], [2], [0, 0, 0, 1, 1, 2], [0], [0]>} : vector<1x8x8xbf16>, vector<1x8x16xbf16>, vector<1x8x16xf32> -> vector<1x8x16xf32>
    "tpu.trace_stop"() : () -> ()
    %93 = vector.shape_cast %92 : vector<1x8x16xf32> to vector<8x16xf32>
    %94 = arith.truncf %93 : vector<8x16xf32> to vector<8x16xbf16>
    %c0_36 = arith.constant 0 : index
    %c32 = arith.constant 32 : index
    %95 = vector.load %arg9[%c0_36, %c32] : memref<8x64xbf16, #tpu.memory_space<vmem>>, vector<8x16xbf16>
    tpu.vector_store %arg9[%c0_36, %c32], %94 {strides = array<i32>} : memref<8x64xbf16, #tpu.memory_space<vmem>>, vector<8x16xbf16>,
    %96 = vector.extract_strided_slice %23 {offsets = [0, 0, 48], sizes = [1, 8, 16], strides = [1, 1, 1]} : vector<1x8x192xf32> to vector<1x8x16xf32>
    %cst_37 = arith.constant 2.500000e-01 : f32
    %97 = vector.broadcast %cst_37 : f32 to vector<1x8x16xf32>
    %98 = arith.mulf %96, %97 : vector<1x8x16xf32>
    %99 = vector.extract_strided_slice %23 {offsets = [0, 0, 112], sizes = [1, 8, 16], strides = [1, 1, 1]} : vector<1x8x192xf32> to vector<1x8x16xf32>
    %100 = vector.extract_strided_slice %23 {offsets = [0, 0, 176], sizes = [1, 8, 16], strides = [1, 1, 1]} : vector<1x8x192xf32> to vector<1x8x16xf32>
    %101 = arith.truncf %98 : vector<1x8x16xf32> to vector<1x8x16xbf16>
    %102 = arith.truncf %99 : vector<1x8x16xf32> to vector<1x8x16xbf16>
    "tpu.trace_start"() <{level = 10 : i32, message = "bqd,bkd->bqk"}> : () -> ()
    %cst_38 = arith.constant dense<0.000000e+00> : vector<1x8x8xf32>
    %103 = tpu.matmul %101, %102, %cst_38 {dimension_numbers = #tpu.dot_dimension_numbers<[2], [2], [1], [1], [0, 0, 0, 1, 1, 1], [0], [0]>} : vector<1x8x16xbf16>, vector<1x8x16xbf16>, vector<1x8x8xf32> -> vector<1x8x8xf32>
    "tpu.trace_stop"() : () -> ()
    %cst_39 = arith.constant dense<0xFF800000> : vector<1x8xf32>
    %104 = vector.multi_reduction <maximumf>, %103, %cst_39 [2] : vector<1x8x8xf32> to vector<1x8xf32>
    %105 = vector.shape_cast %104 : vector<1x8xf32> to vector<1x8x1xf32>
    %106 = vector.broadcast %105 : vector<1x8x1xf32> to vector<1x8x8xf32>
    %107 = arith.subf %103, %106 : vector<1x8x8xf32>
    %108 = math.exp %107 : vector<1x8x8xf32>
    %cst_40 = arith.constant dense<0.000000e+00> : vector<1x8xf32>
    %109 = vector.multi_reduction <add>, %108, %cst_40 [2] : vector<1x8x8xf32> to vector<1x8xf32>
    %110 = vector.shape_cast %109 : vector<1x8xf32> to vector<1x8x1xf32>
    %111 = tpu.reciprocal %110 {approx = true} : vector<1x8x1xf32> -> vector<1x8x1xf32>
    %112 = vector.broadcast %111 : vector<1x8x1xf32> to vector<1x8x8xf32>
    %113 = arith.mulf %108, %112 : vector<1x8x8xf32>
    %114 = arith.truncf %113 : vector<1x8x8xf32> to vector<1x8x8xbf16>
    %115 = arith.truncf %100 : vector<1x8x16xf32> to vector<1x8x16xbf16>
    "tpu.trace_start"() <{level = 10 : i32, message = "bqk,bkd->bqd"}> : () -> ()
    %cst_41 = arith.constant dense<0.000000e+00> : vector<1x8x16xf32>
    %116 = tpu.matmul %114, %115, %cst_41 {dimension_numbers = #tpu.dot_dimension_numbers<[2], [1], [1], [2], [0, 0, 0, 1, 1, 2], [0], [0]>} : vector<1x8x8xbf16>, vector<1x8x16xbf16>, vector<1x8x16xf32> -> vector<1x8x16xf32>
    "tpu.trace_stop"() : () -> ()
    %117 = vector.shape_cast %116 : vector<1x8x16xf32> to vector<8x16xf32>
    %118 = arith.truncf %117 : vector<8x16xf32> to vector<8x16xbf16>
    %c0_42 = arith.constant 0 : index
    %c48 = arith.constant 48 : index
    %119 = vector.load %arg9[%c0_42, %c48] : memref<8x64xbf16, #tpu.memory_space<vmem>>, vector<8x16xbf16>
    tpu.vector_store %arg9[%c0_42, %c48], %118 {strides = array<i32>} : memref<8x64xbf16, #tpu.memory_space<vmem>>, vector<8x16xbf16>,
    %c0_43 = arith.constant 0 : index
    %c0_44 = arith.constant 0 : index
    %120 = vector.load %arg9[%c0_43, %c0_44] : memref<8x64xbf16, #tpu.memory_space<vmem>>, vector<8x64xbf16>
    %cst_45 = arith.constant dense<0.000000e+00> : vector<8x32xf32>
    %121 = tpu.matmul %120, %8, %cst_45 {dimension_numbers = #tpu.dot_dimension_numbers<[1], [0], [0], [1], [0, 0, 1, 1], [], []>} : vector<8x64xbf16>, vector<64x32xbf16>, vector<8x32xf32> -> vector<8x32xf32>
    %122 = arith.addf %121, %4 : vector<8x32xf32>
    %cst_46 = arith.constant dense<0.000000e+00> : vector<8xf32>
    %123 = vector.multi_reduction <add>, %122, %cst_46 [1] : vector<8x32xf32> to vector<8xf32>
    %124 = vector.shape_cast %123 : vector<8xf32> to vector<8x1xf32>
    %cst_47 = arith.constant 3.200000e+01 : f32
    %125 = vector.broadcast %cst_47 : f32 to vector<8x1xf32>
    %126 = arith.divf %124, %125 : vector<8x1xf32>
    %127 = vector.broadcast %126 : vector<8x1xf32> to vector<8x32xf32>
    %128 = arith.subf %122, %127 : vector<8x32xf32>
    %129 = arith.mulf %128, %128 : vector<8x32xf32>
    %cst_48 = arith.constant dense<0.000000e+00> : vector<8xf32>
    %130 = vector.multi_reduction <add>, %129, %cst_48 [1] : vector<8x32xf32> to vector<8xf32>
    %131 = vector.shape_cast %130 : vector<8xf32> to vector<8x1xf32>
    %cst_49 = arith.constant 3.200000e+01 : f32
    %132 = vector.broadcast %cst_49 : f32 to vector<8x1xf32>
    %133 = arith.divf %131, %132 : vector<8x1xf32>
    %cst_50 = arith.constant 9.99999974E-6 : f32
    %134 = vector.broadcast %cst_50 : f32 to vector<8x1xf32>
    %135 = arith.addf %133, %134 : vector<8x1xf32>
    %136 = math.rsqrt %135 : vector<8x1xf32>
    %137 = vector.broadcast %136 : vector<8x1xf32> to vector<8x32xf32>
    %138 = arith.mulf %128, %137 : vector<8x32xf32>
    %139 = vector.broadcast %17 : vector<1x32xf32> to vector<8x32xf32>
    %140 = arith.mulf %138, %139 : vector<8x32xf32>
    %141 = vector.broadcast %18 : vector<1x32xf32> to vector<8x32xf32>
    %142 = arith.addf %140, %141 : vector<8x32xf32>
    %143 = arith.truncf %142 : vector<8x32xf32> to vector<8x32xbf16>
    %cst_51 = arith.constant dense<0.000000e+00> : vector<8x64xf32>
    %144 = tpu.matmul %143, %10, %cst_51 {dimension_numbers = #tpu.dot_dimension_numbers<[1], [0], [0], [1], [0, 0, 1, 1], [], []>} : vector<8x32xbf16>, vector<32x64xbf16>, vector<8x64xf32> -> vector<8x64xf32>
    %145 = vector.broadcast %15 : vector<1x64xf32> to vector<8x64xf32>
    %146 = arith.addf %144, %145 : vector<8x64xf32>
    %cst_52 = arith.constant 0.000000e+00 : f32
    %147 = vector.broadcast %cst_52 : f32 to vector<8x64xf32>
    %148 = arith.maximumf %146, %147 : vector<8x64xf32>
    %149 = arith.truncf %148 : vector<8x64xf32> to vector<8x64xbf16>
    %cst_53 = arith.constant dense<0.000000e+00> : vector<8x32xf32>
    %150 = tpu.matmul %149, %12, %cst_53 {dimension_numbers = #tpu.dot_dimension_numbers<[1], [0], [0], [1], [0, 0, 1, 1], [], []>} : vector<8x64xbf16>, vector<64x32xbf16>, vector<8x32xf32> -> vector<8x32xf32>
    %151 = vector.broadcast %16 : vector<1x32xf32> to vector<8x32xf32>
    %152 = arith.addf %150, %151 : vector<8x32xf32>
    %153 = arith.addf %152, %142 : vector<8x32xf32>
    %cst_54 = arith.constant dense<0.000000e+00> : vector<8xf32>
    %154 = vector.multi_reduction <add>, %153, %cst_54 [1] : vector<8x32xf32> to vector<8xf32>
    %155 = vector.shape_cast %154 : vector<8xf32> to vector<8x1xf32>
    %cst_55 = arith.constant 3.200000e+01 : f32
    %156 = vector.broadcast %cst_55 : f32 to vector<8x1xf32>
    %157 = arith.divf %155, %156 : vector<8x1xf32>
    %158 = vector.broadcast %157 : vector<8x1xf32> to vector<8x32xf32>
    %159 = arith.subf %153, %158 : vector<8x32xf32>
    %160 = arith.mulf %159, %159 : vector<8x32xf32>
    %cst_56 = arith.constant dense<0.000000e+00> : vector<8xf32>
    %161 = vector.multi_reduction <add>, %160, %cst_56 [1] : vector<8x32xf32> to vector<8xf32>
    %162 = vector.shape_cast %161 : vector<8xf32> to vector<8x1xf32>
    %cst_57 = arith.constant 3.200000e+01 : f32
    %163 = vector.broadcast %cst_57 : f32 to vector<8x1xf32>
    %164 = arith.divf %162, %163 : vector<8x1xf32>
    %cst_58 = arith.constant 9.99999974E-6 : f32
    %165 = vector.broadcast %cst_58 : f32 to vector<8x1xf32>
    %166 = arith.addf %164, %165 : vector<8x1xf32>
    %167 = math.rsqrt %166 : vector<8x1xf32>
    %168 = vector.broadcast %167 : vector<8x1xf32> to vector<8x32xf32>
    %169 = arith.mulf %159, %168 : vector<8x32xf32>
    %170 = vector.broadcast %19 : vector<1x32xf32> to vector<8x32xf32>
    %171 = arith.mulf %169, %170 : vector<8x32xf32>
    %172 = vector.broadcast %20 : vector<1x32xf32> to vector<8x32xf32>
    %173 = arith.addf %171, %172 : vector<8x32xf32>
    %174 = vector.shape_cast %173 : vector<8x32xf32> to vector<1x8x32xf32>
    %c0_59 = arith.constant 0 : index
    %c0_60 = arith.constant 0 : index
    %c0_61 = arith.constant 0 : index
    %175 = vector.load %arg8[%c0_59, %c0_60, %c0_61] : memref<1x8x32xf32, #tpu.memory_space<vmem>>, vector<1x8x32xf32>
    tpu.vector_store %arg8[%c0_59, %c0_60, %c0_61], %174 {strides = array<i32>} : memref<1x8x32xf32, #tpu.memory_space<vmem>>, vector<1x8x32xf32>,
    return
  }
  func.func @transform_0(%arg0: i32, %arg1: i32) -> (i32, i32, i32) {
    %c0_i32 = arith.constant 0 : i32
    %c0_i32_0 = arith.constant 0 : i32
    %c0_i32_1 = arith.constant 0 : i32
    return %arg0, %c0_i32, %c0_i32_0 : i32, i32, i32
  }
  func.func @transform_1(%arg0: i32, %arg1: i32) -> (i32, i32, i32) {
    %c0_i32 = arith.constant 0 : i32
    %c0_i32_0 = arith.constant 0 : i32
    %c0_i32_1 = arith.constant 0 : i32
    return %arg1, %c0_i32, %c0_i32_0 : i32, i32, i32
  }
  func.func @transform_2(%arg0: i32, %arg1: i32) -> (i32, i32, i32) {
    %c0_i32 = arith.constant 0 : i32
    %c0_i32_0 = arith.constant 0 : i32
    %c0_i32_1 = arith.constant 0 : i32
    return %arg1, %c0_i32, %c0_i32_0 : i32, i32, i32
  }
  func.func @transform_3(%arg0: i32, %arg1: i32) -> (i32, i32, i32) {
    %c0_i32 = arith.constant 0 : i32
    %c0_i32_0 = arith.constant 0 : i32
    %c0_i32_1 = arith.constant 0 : i32
    return %arg1, %c0_i32, %c0_i32_0 : i32, i32, i32
  }
  func.func @transform_4(%arg0: i32, %arg1: i32) -> (i32, i32, i32) {
    %c0_i32 = arith.constant 0 : i32
    %c0_i32_0 = arith.constant 0 : i32
    %c0_i32_1 = arith.constant 0 : i32
    return %arg1, %c0_i32, %c0_i32_0 : i32, i32, i32
  }
  func.func @transform_5(%arg0: i32, %arg1: i32) -> (i32, i32, i32) {
    %c0_i32 = arith.constant 0 : i32
    %c0_i32_0 = arith.constant 0 : i32
    %c0_i32_1 = arith.constant 0 : i32
    return %arg1, %c0_i32, %c0_i32_0 : i32, i32, i32
  }
  func.func @transform_6(%arg0: i32, %arg1: i32) -> (i32, i32, i32) {
    %c0_i32 = arith.constant 0 : i32
    %c0_i32_0 = arith.constant 0 : i32
    %c0_i32_1 = arith.constant 0 : i32
    return %arg0, %c0_i32, %c0_i32_0 : i32, i32, i32
  }
}

</mosaic_0001>

<bundles_post_ra>
// kernel: tpu_custom_call.1
= control target key start
LH: loop header
LB: loop body
LE: loop exit
PB: predicated region body
PF: predicated region fallthrough
CT: control target
= control target key end

     0   :  { %11 = vsyncpa [#allocation4], 0  ;;  %s2012_s0 = inlined_call_operand.vmem [shape: f32[2,8,32], index: 0, kind: input, shape index: {}]   ;;  %s2013_s1 = inlined_call_operand.vmem [shape: bf16[2,32,192], index: 1, kind: input, shape index: {}]   ;;  %s2014_s2 = inlined_call_operand.vmem [shape: bf16[2,64,32], index: 2, kind: input, shape index: {}]   ;;  %s2015_s3 = inlined_call_operand.vmem [shape: bf16[2,32,64], index: 3, kind: input, shape index: {}]   ;;  %s2016_s4 = inlined_call_operand.vmem [shape: bf16[2,64,32], index: 4, kind: input, shape index: {}]   ;;  %s2017_s5 = inlined_call_operand.vmem [shape: f32[2,8,64], index: 5, kind: input, shape index: {}]   ;;  %s2018_s6 = inlined_call_operand.hbm [shape: f32[2,8,32], index: 6, kind: output, shape index: {}]  }
   0x1   :  { %13 = vsyncpa [#allocation4 + $0x1], 0  ;;  %s1750_s21 = smov 0   ;;  %s1752_s22 = smov 0  }
   0x2   :  { %s1754_s23 = smov 0   ;;  %s1756_s24 = smov 0  }
   0x3   :  { %s1758_s25 = smov 0   ;;  %s1760_s26 = smov 0  }
   0x4   :  { %s1762_s27 = smov 0   ;;  %s1764_s28 = smov 0  }
   0x5 LB: > { %2026 = sst [smem:[#allocation6_spill]] %s1674_s21  ;;  %s1327_s29 = sadd.s32 4294967295, %s1702_s28   ;;  %s1702_s28 = sphi %s1764_s28, %s19_s28   ;;  %s1698_s27 = sphi %s1762_s27, %s2044_s27   ;;  %s1694_s26 = sphi %s1760_s26, %s2047_s26   ;;  %s1690_s25 = sphi %s1758_s25, %s2042_s25   ;;  %s1686_s24 = sphi %s1756_s24, %s2041_s24   ;;  %s1682_s23 = sphi %s1754_s23, %s2040_s23   ;;  %s1678_s22 = sphi %s1752_s22, %s2046_s22   ;;  %s1674_s21 = sphi %s1750_s21, %s2045_s21  }
   0x6   : > { %2027 = sst [smem:[#allocation7_spill]] %s1682_s23  ;;  %s1328_s30 = sadd.s32 4294967294, %s1702_s28  }
   0x7   : > { %2028 = sst [smem:[#allocation8_spill]] %s1694_s26  ;;  %s28_s7 = sadd.s32 1, %s1694_s26 }
   0x8   : > { %2029 = sst [smem:[#allocation9_spill]] %s1698_s27  ;;  %p29_p0 = scmp.ge.s32.totalorder %s28_s7, 2 }
   0x9   : > { %s31_s8 = sadd.s32 1, %s1698_s27  ;;  %p204_p1 = scmp.ne.s32.totalorder %s1682_s23, %s1678_s22 }
   0xa   : > { %p205_p2 = scmp.eq.s32.totalorder %s1327_s29, 3  ;;  %s2049_s7 = smov (%p29_p0, %s28_s7), 0 }
   0xb   : > { %2030 = sst [smem:[#allocation10_spill]] %s2049_s7  ;;  %s2051_s8 = smov (!%p29_p0, %s31_s8), %s1698_s27 }
   0xc   : > { %p1799_p3 = por %p205_p2, %p204_p1  ;;  %p210_p4 = scmp.ne.s32.totalorder %s1678_s22, %s1674_s21 }
   0xd   : > { %p33_p5 = scmp.ge.s32.totalorder %s2051_s8, 2  ;;  %p211_p6 = scmp.eq.s32.totalorder %s1328_s30, 3 }
   0xe   : > { %p1331_p7 = scmp.ge.s32.totalorder %s1702_s28, 1  ;;  %p275_p8 = scmp.lt.s32.totalorder %s1702_s28, 5 }
   0xf   : > { %s2053_s8 = smov (%p33_p5, %s2051_s8), 0  ;;  %p1809_p9 = por %p211_p6, %p210_p4 }
  0x10   : > { %2032 = sst [smem:[#allocation11_spill]] %s2053_s8  ;;  %p276_p10 = pnand %p1331_p7, %p275_p8 }
  0x11   : > { %s2033_s10 = scalar_select %p1809_p9, 1, 0 }
  0x12   : > { %s191_s11 = ssub.s32 %s1698_s27, %s2053_s8  ;;  %s194_s12 = sadd.s32 1, %s1682_s23 }
  0x13   : > { %2034 = sst [smem:[#allocation12_spill]] %s2033_s10  ;;  %p192_p11 = scmp.eq.s32.totalorder %s191_s11, 0 }
  0x14   : > { %279 = sbr.rel (%p276_p10) target bundleno = 2474 (0x9aa), region = 44  ;;  %s2022_s14 = sand.u32 (!%p276_p10), 1, %s1678_s22  }
  0x15   : > { %s1817_s13 = scalar_select %p192_p11, %s1682_s23, %s194_s12  }
  0x16   : > { %p328_p12 = scmp.lt.s32.totalorder (!%p276_p10), %s1690_s25, 1  ;;  %s1332_s15 = sshll.u32 (!%p276_p10), %s2022_s14, 3 }
  0x17   : > { %2035 = sst [smem:[#allocation13_spill]] %s1817_s13  ;;  %p332_p13 = scmp.lt.s32.totalorder (!%p276_p10), %s1686_s24, 1 }
  0x18   : > { %s1852_s27 = scalar_lea.vmem (!%p276_p10), [#allocation3], %s1332_s15  ;;  %p1343_p0 = scmp.ne.s32.totalorder (!%p276_p10), %s1686_s24, 0 }
  0x19   : > { %s329_s16 = scalar_select %p328_p12, %s1690_s25, 1 }
  0x1a   : > { %s333_s17 = scalar_select %p332_p13, %s1686_s24, 1 }
  0x1b   : > { %s1333_s18 = sshll.u32 %s329_s16, 3 }
  0x1c   : > { %s331_s29 = scalar_lea.vmem %s2012_s0, %s1333_s18  ;;  %s1377_s30 = sshll.u32 %s333_s17, 5 }
  0x1d   : > { %s336_s8 = scalar_lea.vmem %s2013_s1, %s1377_s30  ;;  %s1835_s26 = scalar_lea.vmem %s2014_s2, %s1377_s30 }
  0x1e   : > { %s1379_s13 = sshll.u32 %s333_s17, 4  ;;  %s1840_s10 = scalar_lea.vmem %s2016_s4, %s1377_s30 }
  0x1f   : > { %s1845_s18 = scalar_lea.vmem %s2015_s3, %s1379_s13  ;;  %s1342_s19 = sshll.u32 %s333_s17, 3 }
  0x20   : > { %s1850_s12 = scalar_lea.vmem %s2017_s5, %s1342_s19  ;;  %360 = sbr.rel (%p1343_p0) target bundleno = 39 (0x27), region = 48 }
  0x25   : > { %v361_v0 = vld [vmem:[%s331_s29] sm:$0xff]  ;;  %vm362_vm0 = vcmask 261120  }
  0x26   : > { %363 = vst.msk [vmem:[%s1852_s27] sm:$0xff] %vm362_vm0, %v361_v0 }
  0x27 PF: > { %v1574_v1 = vld [vmem:[%s336_s8 + $0x14] ss:$8 sps:$4 sm:$0xff]   ;;  %v1576_v2 = vld [vmem:[%s336_s8 + $0x10] ss:$8 sps:$4 sm:$0xff]   ;;  %v1704_v3 = vmov 0   ;;  %vm411_vm1 = vcmask 261120  }
  0x28   : > { %447 = vmatprep.mubr.bf16.mxu1 %v1704_v3  ;;  %427 = vmatprep.subr.bf16.mxu1 %v1574_v1  ;;  %v1577_v4 = vld [vmem:[%s336_s8 + $0x4] ss:$8 sps:$4 sm:$0xff]   ;;  %v1579_v5 = vld [vmem:[%s336_s8] ss:$8 sps:$4 sm:$0xff]   ;;  %v1705_v8 = vmov 0.0   ;;  %vm1706_vm2 = vmmov 0  }
  0x29   : > { %428 = vmatpush1.bf16.msra.mxu1 %v1576_v2  ;;  %1419 = vmatprep.subr.bf16.mxu0 %v1705_v8  ;;  %vm526_vm3 = vcmask 1043456   ;;  %s1707_s21 = smov 64   ;;  %s1708_s23 = smov 112   ;;  %vm462_vm4 = vcmask 130048   ;;  %vm509_vm5 = vcmask 64512   ;;  %vm571_vm6 = vcmask 125952  }
  0x2a   : > { %429 = vmatprep.subr.bf16.mxu1 %v1577_v4  ;;  %1421 = vmatprep.mubr.msk.bf16.mxu0 %vm1706_vm2, %v1705_v8  ;;  %s1709_s24 = smov 48   ;;  %s1710_s7 = smov 32   ;;  %vm692_vm7 = vcmask 257152   ;;  %vm811_vm8 = vcmask 388352   ;;  %vm930_vm9 = vcmask 519552   ;;  %vm957_vm10 = vcmask 523264  }
  0x2b   : > { %s1711_s8 = smov 96   ;;  %s1712_s13 = smov 16  }
  0x2c   : > { %s1713_s14 = smov 80   ;;  %s2036_s30 = sand.u32 1, %s1678_s22  }
  0x2d   : > { %v1857_v6 = vld [vmem:[%s1852_s27] sm:$0xff]  ;;  %430 = vmatpush1.bf16.msra.mxu1 %v1579_v5  ;;  %s1184_s16 = scalar_lea.sflag [#allocation4], %s2036_s30  ;;  %s1714_s19 = smov [#allocation3]  }
  0x2e   : > { %v390_v7 = vpack.c.bf16 %v1857_v6, %v1857_v6  ;;  %1413 = vmatprep.subr.bf16.mxu1 %v1705_v8  ;;  %s1614_s20 = sshll.u32 %s1714_s19, 4  ;;  %s1615_s20 = int_to_ptr.vmem [resolvable:$false] %s1614_s20 }
  0x30   : > { %1348 = vmatmul.mubr.msk.bf16.vlgmr.msra.gmra.mxu1 %vm411_vm1, %v390_v7 }
  0x31   : > { %1415 = vmatprep.mubr.msk.bf16.mxu1 %vm1706_vm2, %v1705_v8 }
  0xf0   : > { %v449_v9 = vpop.f32.mrf.mxu1 }
  0xf1   : > { %v456_v10 = vmul.f32 0.25, %v449_v9  ;;  %v458_v11 = vpack.c.bf16 %v449_v9, %v449_v9 }
  0xf2   : > { %v451_v12 = vpop.f32.mrf.mxu1 }
  0xf3   : > { %v457_v13 = vpack.c.bf16 %v456_v10, %v456_v10  ;;  %v1868_v14 = vpack.c.bf16 %v451_v12, %v451_v12  ;;  %460 = vrot.lane.b32.xlu0 %v458_v11, %s1707_s21 }
  0xf4   : > { %v453_v15 = vpop.f32.mrf.mxu1 }
  0xf5   : > { %574 = vrot.lane.b32.xlu1 %v457_v13, %s1708_s23  ;;  %v528_v16 = vsel %vm526_vm3, %v1868_v14, 0 }
  0xf6   : > { %v454_v17 = vpop.f32.mrf.mxu1  ;;  %1420 = vmatpush3.bf16.msra.mxu0 %v528_v16 }
  0xf7   : > { %576 = vrot.lane.b32.xlu0 %v458_v11, %s1709_s24  ;;  %1431 = vmatprep.subr.bf16.mxu0 %v1705_v8 }
  0xf9   : > { %696 = vrot.lane.b32.xlu1 %v458_v11, %s1710_s7 }
  0xfb   : > { %694 = vrot.lane.b32.xlu0 %v457_v13, %s1711_s8 }
  0xfd   : > { %815 = vrot.lane.b32.xlu1 %v458_v11, %s1712_s13 }
  0xff   : > { %813 = vrot.lane.b32.xlu0 %v457_v13, %s1713_s14 }
 0x165   : > { %v461_v18 = vpop.permute.xlu0 %460 }
 0x166   : > { %v467_v19 = vsel %vm462_vm4, %v461_v18, 0 }
 0x167   : > { %1414 = vmatpush3.bf16.xpose.msra.mxu1 %v467_v19  ;;  %v575_v21 = vpop.permute.xlu1 %574 }
 0x168   : > { %1425 = vmatprep.subr.bf16.mxu1 %v1705_v8 }
 0x169   : > { %v577_v20 = vpop.permute.xlu0 %576 }
 0x16a   : > { %v582_v22 = vsel %vm462_vm4, %v577_v20, 0 }
 0x16b   : > { %v697_v23 = vpop.permute.xlu1 %696 }
 0x16c   : > { %v702_v24 = vsel %vm462_vm4, %v697_v23, 0 }
 0x16d   : > { %v695_v26 = vpop.permute.xlu0 %694 }
 0x16e   : > { %1416 = vmatmul.mubr.msk.bf16.vlgmr.msra.gmra.mxu1 %vm462_vm4, %v457_v13 }
 0x16f   : > { %1426 = vmatpush3.bf16.xpose.msra.mxu1 %v582_v22  ;;  %1427 = vmatprep.mubr.msk.bf16.mxu1 %vm1706_vm2, %v1705_v8  ;;  %v816_v25 = vpop.permute.xlu1 %815 }
 0x170   : > { %1437 = vmatprep.subr.bf16.mxu1 %v1705_v8  ;;  %v821_v27 = vsel %vm462_vm4, %v816_v25, 0 }
 0x171   : > { %v814_v28 = vpop.permute.xlu0 %813 }
 0x176   : > { %1428 = vmatmul.mubr.msk.bf16.vlgmr.msra.gmra.mxu1 %vm462_vm4, %v575_v21 }
 0x177   : > { %1438 = vmatpush3.bf16.xpose.msra.mxu1 %v702_v24  ;;  %1439 = vmatprep.mubr.msk.bf16.mxu1 %vm1706_vm2, %v1705_v8 }
 0x178   : > { %1449 = vmatprep.subr.bf16.mxu1 %v1705_v8 }
 0x17e   : > { %1440 = vmatmul.mubr.msk.bf16.vlgmr.msra.gmra.mxu1 %vm462_vm4, %v695_v26 }
 0x17f   : > { %1450 = vmatpush3.bf16.xpose.msra.mxu1 %v821_v27  ;;  %1451 = vmatprep.mubr.msk.bf16.mxu1 %vm1706_vm2, %v1705_v8 }
 0x180   : > { %1461 = vmatprep.subr.bf16.mxu1 %v1705_v8 }
 0x186   : > { %1452 = vmatmul.mubr.msk.bf16.vlgmr.msra.gmra.mxu1 %vm462_vm4, %v814_v28 }
 0x187   : > { %1469 = vmatprep.mubr.msk.bf16.mxu1 %vm1706_vm2, %v1705_v8 }
 0x22e   : > { %v503_v29 = vpop.f32.mrf.mxu1 }
 0x22f   : > { %v510_v30 = vsel %vm509_vm5, %v503_v29, -inf }
 0x230   : > { %511 = vmax.xlane.f32.xlu1 %v510_v30  ;;  %v1417_v31 = vpop.f32.mrf.mxu1 }
 0x232   : > { %v506_v32 = vpop.f32.mrf.mxu1 }
 0x234   : > { %v1418_v33 = vpop.f32.mrf.mxu1 }
 0x236   : > { %v618_v34 = vpop.f32.mrf.mxu1 }
 0x237   : > { %v624_v35 = vsel %vm509_vm5, %v618_v34, -inf }
 0x238   : > { %625 = vmax.xlane.f32.xlu0 %v624_v35  ;;  %v1429_v36 = vpop.f32.mrf.mxu1 }
 0x239   : > { %v1581_v36 = vld [vmem:[%s1835_s26 + $0x10] sm:$0xff]  }
 0x23a   : > { %v621_v37 = vpop.f32.mrf.mxu1 }
 0x23c   : > { %v1430_v38 = vpop.f32.mrf.mxu1 }
 0x23e   : > { %v738_v39 = vpop.f32.mrf.mxu1 }
 0x23f   : > { %v744_v40 = vsel %vm509_vm5, %v738_v39, -inf }
 0x240   : > { %745 = vmax.xlane.f32.xlu0 %v744_v40  ;;  %v1441_v41 = vpop.f32.mrf.mxu1 }
 0x242   : > { %v741_v42 = vpop.f32.mrf.mxu1 }
 0x244   : > { %v1442_v43 = vpop.f32.mrf.mxu1 }
 0x246   : > { %v857_v44 = vpop.f32.mrf.mxu1 }
 0x247   : > { %v863_v45 = vsel %vm509_vm5, %v857_v44, -inf }
 0x248   : > { %864 = vmax.xlane.f32.xlu1 %v863_v45  ;;  %v1453_v46 = vpop.f32.mrf.mxu1 }
 0x249   : > { %v1582_v46 = vld [vmem:[%s1835_s26 + $0x8] sm:$0xff]  }
 0x24a   : > { %v860_v47 = vpop.f32.mrf.mxu1 }
 0x24b   : > { %v1583_v47 = vld [vmem:[%s1835_s26] sm:$0xff]  }
 0x24c   : > { %v1454_v48 = vpop.f32.mrf.mxu1 }
 0x2b9   : > { %v512_v49 = vpop.xlane.xlu1 %511 }
 0x2ba   : > { %v513_v50 = vsub.f32 %v503_v29, %v512_v49 }
 0x2bc   : > { %v514_v51 = vmul.f32 1.442695, %v513_v50 }
 0x2be   : > { %1590 = vpow2.f32 %v514_v51 }
 0x2c1   : > { %v626_v52 = vpop.xlane.xlu0 %625 }
 0x2c2   : > { %v627_v53 = vsub.f32 %v618_v34, %v626_v52  ;;  %v1580_v34 = vld [vmem:[%s1835_s26 + $0x18] sm:$0xff]   ;;  %s1374_s26 = sshll.u32 %s1690_s25, 7  ;;  %s1616_s25 = scalar_lea.vmem %s1615_s20, 256 }
 0x2c3   : > { %1462 = vmatpush3.bf16.msra.mxu1 %v1580_v34  ;;  %s1195_s29 = scalar_lea.hbm %s2018_s6, %s1374_s26 }
 0x2c4   : > { %v628_v54 = vmul.f32 1.442695, %v627_v53  ;;  %1463 = vmatprep.subr.bf16.mxu1 %v1705_v8 }
 0x2c6   : > { %1592 = vpow2.f32 %v628_v54 }
 0x2c7   : > { %1464 = vmatpush3.bf16.msra.mxu1 %v1581_v36 }
 0x2c8   : > { %1465 = vmatprep.subr.bf16.mxu1 %v1705_v8 }
 0x2c9   : > { %v746_v55 = vpop.xlane.xlu0 %745 }
 0x2ca   : > { %v747_v56 = vsub.f32 %v738_v39, %v746_v55 }
 0x2cb   : > { %v1591_v57 = vpop.eup %1590  ;;  %1466 = vmatpush3.bf16.msra.mxu1 %v1582_v46 }
 0x2cc   : > { %v748_v58 = vmul.f32 1.442695, %v747_v56  ;;  %v516_v59 = vsel %vm509_vm5, %v1591_v57, 0.0  ;;  %1467 = vmatprep.subr.bf16.mxu1 %v1705_v8 }
 0x2cd   : > { %517 = vadd.xlane.f32.xlu0 %v516_v59 }
 0x2ce   : > { %1594 = vpow2.f32 %v748_v58 }
 0x2cf   : > { %1468 = vmatpush3.bf16.msra.mxu1 %v1583_v47 }
 0x2d1   : > { %v865_v0 = vpop.xlane.xlu1 %864 }
 0x2d2   : > { %v866_v1 = vsub.f32 %v857_v44, %v865_v0 }
 0x2d3   : > { %v1593_v60 = vpop.eup %1592 }
 0x2d4   : > { %v630_v61 = vsel %vm509_vm5, %v1593_v60, 0.0  ;;  %v867_v2 = vmul.f32 1.442695, %v866_v1 }
 0x2d5   : > { %631 = vadd.xlane.f32.xlu1 %v630_v61 }
 0x2d6   : > { %1596 = vpow2.f32 %v867_v2 }
 0x2db   : > { %v1595_v62 = vpop.eup %1594 }
 0x2dc   : > { %v750_v63 = vsel %vm509_vm5, %v1595_v62, 0.0 }
 0x2dd   : > { %751 = vadd.xlane.f32.xlu0 %v750_v63 }
 0x2e3   : > { %v1597_v3 = vpop.eup %1596 }
 0x2e4   : > { %v869_v4 = vsel %vm509_vm5, %v1597_v3, 0.0 }
 0x2e6   : > { %756 = vrot.lane.b32.xlu1 %v1868_v14, %s1711_s8 }
 0x2f3   : > { %637 = vrot.lane.b32.xlu0 %v1868_v14, %s1708_s23 }
 0x30a   : > { %870 = vadd.xlane.f32.xlu1 %v869_v4  ;;  %v1584_v4 = vld [vmem:[%s1845_s18 + $0x8] sm:$0xff]  }
 0x31b   : > { %875 = vrot.lane.b32.xlu1 %v1868_v14, %s1713_s14 }
 0x356   : > { %v518_v5 = vpop.xlane.xlu0 %517 }
 0x357   : > { %1598 = vrcp.f32 %v518_v5  ;;  %v1585_v5 = vld [vmem:[%s1845_s18] sm:$0xff]  }
 0x35e   : > { %v632_v7 = vpop.xlane.xlu1 %631 }
 0x35f   : > { %1600 = vrcp.f32 %v632_v7 }
 0x362   : > { %v757_v17 = vpop.permute.xlu1 %756 }
 0x363   : > { %v762_v19 = vsel %vm526_vm3, %v757_v17, 0 }
 0x364   : > { %v1599_v9 = vpop.eup %1598 }
 0x365   : > { %v520_v10 = vmul.f32 %v1599_v9, %v1591_v57 }
 0x366   : > { %v752_v11 = vpop.xlane.xlu0 %751 }
 0x367   : > { %1602 = vrcp.f32 %v752_v11  ;;  %v521_v12 = vpack.c.bf16 %v520_v10, %v520_v10  ;;  %v1015_v10 = vlaneseq }
 0x369   : > { %1422 = vmatmul.mubr.msk.bf16.vlgmr.msra.gmra.mxu0 %vm509_vm5, %v521_v12  ;;  %v1016_v11 = vshrl.u32 %v1015_v10, 7 }
 0x36a   : > { %v638_v13 = vpop.permute.xlu0 %637  ;;  %1433 = vmatprep.mubr.msk.bf16.mxu0 %vm1706_vm2, %v1705_v8 }
 0x36b   : > { %v643_v15 = vsel %vm526_vm3, %v638_v13, 0  ;;  %v1017_v12 = vsub.s32 2, %v1016_v11  ;;  %v389_v13 = vld [vmem:[%s1850_s12] sm:$0xff] }
 0x36c   : > { %v1601_v16 = vpop.eup %1600  ;;  %1432 = vmatpush3.bf16.msra.mxu0 %v643_v15  ;;  %v1022_v15 = vsub.s32 3, %v1016_v11 }
 0x36d   : > { %1443 = vmatprep.subr.bf16.mxu0 %v1705_v8  ;;  %v634_v14 = vmul.f32 %v1601_v16, %v1593_v60  ;;  %v1018_v16 = vrot.slane %v389_v13, %v1017_v12 }
 0x36f   : > { %v635_v18 = vpack.c.bf16 %v634_v14, %v634_v14 }
 0x371   : > { %1434 = vmatmul.mubr.msk.bf16.vlgmr.msra.gmra.mxu0 %vm509_vm5, %v635_v18  ;;  %v1023_v18 = vrot.slane %v389_v13, %v1022_v15 }
 0x372   : > { %1444 = vmatpush3.bf16.msra.mxu0 %v762_v19  ;;  %1445 = vmatprep.mubr.msk.bf16.mxu0 %vm1706_vm2, %v1705_v8 }
 0x373   : > { %1455 = vmatprep.subr.bf16.mxu0 %v1705_v8 }
 0x374   : > { %v1603_v20 = vpop.eup %1602 }
 0x375   : > { %v754_v21 = vmul.f32 %v1603_v20, %v1595_v62 }
 0x377   : > { %v755_v22 = vpack.c.bf16 %v754_v21, %v754_v21  ;;  %v1586_v21 = vld [vmem:[%s1840_s10 + $0x18] sm:$0xff]  }
 0x379   : > { %1446 = vmatmul.mubr.msk.bf16.vlgmr.msra.gmra.mxu0 %vm509_vm5, %v755_v22 }
 0x37a   : > { %1457 = vmatprep.mubr.msk.bf16.mxu0 %vm1706_vm2, %v1705_v8 }
 0x393   : > { %v871_v23 = vpop.xlane.xlu1 %870 }
 0x394   : > { %1604 = vrcp.f32 %v871_v23  ;;  %v1587_v23 = vld [vmem:[%s1840_s10 + $0x10] sm:$0xff]  }
 0x397   : > { %v876_v24 = vpop.permute.xlu1 %875 }
 0x398   : > { %v881_v25 = vsel %vm526_vm3, %v876_v24, 0  ;;  %v1588_v24 = vld [vmem:[%s1840_s10 + $0x8] sm:$0xff]  }
 0x399   : > { %1456 = vmatpush3.bf16.msra.mxu0 %v881_v25  ;;  %v1589_v25 = vld [vmem:[%s1840_s10] sm:$0xff]   ;;  %s1197_s10 = sshll.u32 %s1852_s27, 4  ;;  %s1198_s10 = int_to_ptr.vmem [resolvable:$true] %s1197_s10 }
 0x39a   : > { %1473 = vmatprep.subr.bf16.mxu0 %v1705_v8  ;;  %s1610_s18 = scalar_lea.vmem %s1198_s10, 128  ;;  %p1617_p5 = scmp.lt.s32.totalorder %s1198_s10, %s1615_s20 }
 0x39b   : > { %p1611_p1 = scmp.ne.s32.totalorder %s1198_s10, %s1610_s18  ;;  %p1618_p6 = scmp.lt.s32.totalorder %s1616_s25, %s1610_s18 }
 0x39d   : > { %p1612_p2 = pnand %p1611_p1, %p1799_p3  ;;  %p1619_p7 = por %p1618_p6, %p1617_p5 }
 0x39f   : > { %p1613_p4 = pneg %p1612_p2 }
 0x3a1   : > { %v1605_v26 = vpop.eup %1604  ;;  %p1620_p8 = pnand %p1619_p7, %p1613_p4 }
 0x3a2   : > { %v873_v27 = vmul.f32 %v1605_v26, %v1597_v3  ;;  %v1028_v26 = vsub.s32 0, %v1016_v11 }
 0x3a4   : > { %v874_v28 = vpack.c.bf16 %v873_v27, %v873_v27  ;;  %v1029_v27 = vrot.slane %v389_v13, %v1028_v26 }
 0x3a6   : > { %1458 = vmatmul.mubr.msk.bf16.vlgmr.msra.gmra.mxu0 %vm509_vm5, %v874_v28 }
 0x3a7   : > { %1477 = vmatprep.mubr.msk.bf16.mxu0 %vm1706_vm2, %v1705_v8  ;;  %1474 = vmatpush3.bf16.msra.mxu0 %v1584_v4 }
 0x3a8   : > { %1475 = vmatprep.subr.bf16.mxu0 %v1705_v8 }
 0x3ab   : > { %1476 = vmatpush3.bf16.msra.mxu0 %v1585_v5 }
 0x3ac   : > { %1481 = vmatprep.subr.bf16.mxu0 %v1705_v8 }
 0x429   : > { %v564_v29 = vpop.f32.mrf.mxu0 }
 0x42a   : > { %v570_v30 = vpack.c.bf16 %v564_v29, %v564_v29 }
 0x42b   : > { %v1423_v31 = vpop.f32.mrf.mxu0 }
 0x42c   : > { %572 = vst.msk [vmem:[#allocation2] sm:$0xf] %vm571_vm6, %v570_v30 }
 0x42d   : > { %v567_v32 = vpop.f32.mrf.mxu0 }
 0x42f   : > { %v1424_v33 = vpop.f32.mrf.mxu0 }
 0x431   : > { %v679_v35 = vpop.f32.mrf.mxu0 }
 0x432   : > { %v1381_v37 = vpack.c.bf16 %v679_v35, %v679_v35  ;;  %v1089_v35 = vsub.s32 1, %v1016_v11 }
 0x433   : > { %v1435_v38 = vpop.f32.mrf.mxu0 }
 0x434   : > { %689 = vrot.lane.b32.xlu0 %v1381_v37, %s1712_s13  ;;  %v1090_v36 = vrot.slane %v389_v13, %v1089_v35 }
 0x435   : > { %v682_v39 = vpop.f32.mrf.mxu0 }
 0x437   : > { %v1436_v40 = vpop.f32.mrf.mxu0 }
 0x439   : > { %v798_v41 = vpop.f32.mrf.mxu0 }
 0x43a   : > { %v1382_v42 = vpack.c.bf16 %v798_v41, %v798_v41 }
 0x43b   : > { %v1447_v43 = vpop.f32.mrf.mxu0 }
 0x43c   : > { %808 = vrot.lane.b32.xlu1 %v1382_v42, %s1710_s7 }
 0x43d   : > { %v801_v44 = vpop.f32.mrf.mxu0 }
 0x43f   : > { %v1448_v45 = vpop.f32.mrf.mxu0 }
 0x466   : > { %v917_v48 = vpop.f32.mrf.mxu0 }
 0x467   : > { %v1383_v49 = vpack.c.bf16 %v917_v48, %v917_v48 }
 0x468   : > { %v1459_v50 = vpop.f32.mrf.mxu0 }
 0x469   : > { %927 = vrot.lane.b32.xlu0 %v1383_v49, %s1709_s24 }
 0x46a   : > { %v920_v51 = vpop.f32.mrf.mxu0 }
 0x46b   : > { %v1174_v51 = vsub.s32 4, %v1016_v11 }
 0x46c   : > { %v1460_v52 = vpop.f32.mrf.mxu0 }
 0x46d   : > { %v1179_v52 = vsub.s32 5, %v1016_v11 }
 0x4a6   : > { %v690_v53 = vpop.permute.xlu0 %689 }
 0x4a7   : > { %693 = vst.msk [vmem:[#allocation2] sm:$0xf] %vm692_vm7, %v690_v53  ;;  %v1175_v53 = vrot.slane %v389_v13, %v1174_v51 }
 0x4ae   : > { %v809_v54 = vpop.permute.xlu1 %808 }
 0x4af   : > { %812 = vst.msk [vmem:[#allocation2] sm:$0xf] %vm811_vm8, %v809_v54 }
 0x4db   : > { %v928_v55 = vpop.permute.xlu0 %927 }
 0x4dc   : > { %931 = vst.msk [vmem:[#allocation2] sm:$0xf] %vm930_vm9, %v928_v55 }
 0x4e3   : > { %v932_v56 = vld [vmem:[#allocation2] sm:$0xf] }
 0x4e4   : > { %1470 = vmatmul.mubr.msk.bf16.vlgmr.msra.gmra.mxu1 %vm957_vm10, %v932_v56  ;;  %v1180_v56 = vrot.slane %v389_v13, %v1179_v52 }
 0x5a4   : > { %v995_v57 = vpop.f32.mrf.mxu1 }
 0x5a5   : > { %v996_v58 = vadd.f32 %v995_v57, %v1857_v6 }
 0x5a6   : > { %v1471_v59 = vpop.f32.mrf.mxu1 }
 0x5a7   : > { %v1001_v60 = vsel %vm411_vm1, %v996_v58, 0.0 }
 0x5a8   : > { %1002 = vadd.xlane.f32.xlu1 %v1001_v60  ;;  %v998_v61 = vpop.f32.mrf.mxu1 }
 0x5aa   : > { %v1472_v62 = vpop.f32.mrf.mxu1 }
 0x631   : > { %v1003_v63 = vpop.xlane.xlu1 %1002 }
 0x632   : > { %v1005_v0 = vmul.f32 0.03125, %v1003_v63 }
 0x634   : > { %v1006_v1 = vsub.f32 %v996_v58, %v1005_v0 }
 0x636   : > { %v1007_v2 = vmul.f32 %v1006_v1, %v1006_v1 }
 0x638   : > { %v1008_v3 = vsel %vm411_vm1, %v1007_v2, 0.0 }
 0x639   : > { %1009 = vadd.xlane.f32.xlu0 %v1008_v3 }
 0x6c2   : > { %v1010_v6 = vpop.xlane.xlu0 %1009 }
 0x6c3   : > { %v1011_v7 = vmul.f32 0.03125, %v1010_v6 }
 0x6c5   : > { %v1012_v9 = vadd.f32 1e-05, %v1011_v7 }
 0x6c7   : > { %1606 = vrsqrt.f32 %v1012_v9 }
 0x6d4   : > { %v1607_v14 = vpop.eup %1606 }
 0x6d5   : > { %v1014_v17 = vmul.f32 %v1607_v14, %v1006_v1 }
 0x6d7   : > { %v1019_v19 = vmul.f32 %v1018_v16, %v1014_v17 }
 0x6d9   : > { %v1024_v20 = vadd.f32 %v1023_v18, %v1019_v19 }
 0x6db   : > { %v1025_v22 = vpack.c.bf16 %v1024_v20, %v1024_v20 }
 0x6dd   : > { %1478 = vmatmul.mubr.msk.bf16.vlgmr.msra.gmra.mxu0 %vm411_vm1, %v1025_v22 }
 0x6de   : > { %1482 = vmatpush3.bf16.msra.mxu0 %v1586_v21  ;;  %1489 = vmatprep.mubr.msk.bf16.mxu0 %vm1706_vm2, %v1705_v8 }
 0x6df   : > { %1483 = vmatprep.subr.bf16.mxu0 %v1705_v8 }
 0x6e2   : > { %1484 = vmatpush3.bf16.msra.mxu0 %v1587_v23 }
 0x6e3   : > { %1485 = vmatprep.subr.bf16.mxu0 %v1705_v8 }
 0x6e6   : > { %1486 = vmatpush3.bf16.msra.mxu0 %v1588_v24 }
 0x6e7   : > { %1487 = vmatprep.subr.bf16.mxu0 %v1705_v8 }
 0x6ea   : > { %1488 = vmatpush3.bf16.msra.mxu0 %v1589_v25 }
 0x79d   : > { %v1079_v28 = vpop.f32.mrf.mxu0 }
 0x79e   : > { %v1080_v29 = vadd.f32 %v1079_v28, %v1029_v27 }
 0x79f   : > { %v1479_v30 = vpop.f32.mrf.mxu0 }
 0x7a0   : > { %v1085_v31 = vmax.f32 %v1080_v29, 0.0 }
 0x7a1   : > { %v1082_v32 = vpop.f32.mrf.mxu0 }
 0x7a2   : > { %v1086_v33 = vpack.c.bf16 %v1085_v31, %v1085_v31 }
 0x7a3   : > { %v1480_v34 = vpop.f32.mrf.mxu0 }
 0x7a4   : > { %1490 = vmatmul.mubr.msk.bf16.vlgmr.msra.gmra.mxu0 %vm957_vm10, %v1086_v33 }
 0x864   : > { %v1152_v37 = vpop.f32.mrf.mxu0 }
 0x865   : > { %v1153_v38 = vadd.f32 %v1152_v37, %v1090_v36 }
 0x866   : > { %v1491_v39 = vpop.f32.mrf.mxu0 }
 0x867   : > { %v1158_v40 = vadd.f32 %v1153_v38, %v1024_v20 }
 0x868   : > { %v1155_v8 = vpop.f32.mrf.mxu0 }
 0x869   : > { %v1159_v41 = vsel %vm411_vm1, %v1158_v40, 0.0 }
 0x86a   : > { %1160 = vadd.xlane.f32.xlu0 %v1159_v41  ;;  %v1492_v42 = vpop.f32.mrf.mxu0 }
 0x8f3   : > { %v1161_v43 = vpop.xlane.xlu0 %1160 }
 0x8f4   : > { %v1162_v44 = vmul.f32 0.03125, %v1161_v43 }
 0x8f6   : > { %v1163_v45 = vsub.f32 %v1158_v40, %v1162_v44 }
 0x8f8   : > { %v1164_v46 = vmul.f32 %v1163_v45, %v1163_v45 }
 0x8fa   : > { %v1165_v47 = vsel %vm411_vm1, %v1164_v46, 0.0 }
 0x8fb   : > { %1166 = vadd.xlane.f32.xlu1 %v1165_v47 }
 0x984   : > { %v1167_v48 = vpop.xlane.xlu1 %1166 }
 0x985   : > { %v1168_v49 = vmul.f32 0.03125, %v1167_v48 }
 0x987   : > { %v1169_v50 = vadd.f32 1e-05, %v1168_v49 }
 0x989   : > { %1608 = vrsqrt.f32 %v1169_v50 }
 0x996   : > { %v1609_v54 = vpop.eup %1608 }
 0x997   : > { %v1171_v55 = vmul.f32 %v1609_v54, %v1163_v45 }
 0x999   : > { %v1176_v57 = vmul.f32 %v1175_v53, %v1171_v55 }
 0x99b   : > { %v1181_v58 = vadd.f32 %v1180_v56, %v1176_v57 }
 0x99d   : > { %1182 = vst.msk [vmem:[%s1852_s27] sm:$0xff] %vm411_vm1, %v1181_v58 }
 0x99e   : > { %1623 = shalt.err (!%p1620_p8)
}
 0x99f   : > { %s1624_s11 = scalar_lea.hbm %s1195_s29, 128  ;;  %s1628_s21 = scalar_lea.hbm %s2018_s6, 256 }
 0x9a0   : > { %p1625_p10 = scmp.ne.s32.totalorder %s1195_s29, %s1624_s11  ;;  %p1629_p13 = scmp.lt.s32.totalorder %s1195_s29, %s2018_s6 }
 0x9a1   : > { %p1630_p0 = scmp.lt.s32.totalorder %s1628_s21, %s1624_s11 }
 0x9a2   : > { %p1626_p11 = pnand %p1625_p10, %p1799_p3 }
 0x9a3   : > { %p1631_p1 = por %p1630_p0, %p1629_p13 }
 0x9a4   : > { %p1627_p12 = pneg %p1626_p11 }
 0x9a6   : > { %p1632_p2 = pnand %p1631_p1, %p1627_p12 }
 0x9a8   : > { %1635 = shalt.err (!%p1632_p2)
}
 0x9a9   : > { %1493 = dma.vmem_to_hbm [thread:$0]  (%p1799_p3), %s1198_s10, 128, %s1195_s29, %s1184_s16  }
 0x9aa PF: > { %s2037_s7 = sld [smem:[#allocation6_spill]]  ;;  %p1499_p4 = scmp.ge.s32.totalorder %s1702_s28, 2 }
 0x9ac   : > { %p1496_p5 = pnand %p1499_p4, %p1809_p9 }
 0x9ae   : > { %p1497_p6 = pneg %p1496_p5 }
 0x9b0   : > { %s1209_s13 = sand.u32 1, %s2037_s7  }
 0x9b1   : > { %s1210_s14 = scalar_lea.sflag [#allocation4], %s1209_s13 }
 0x9b2   : > { %1669 = dma.done.wait (%p1497_p6), %s1210_s14, 128  }
 0x9b3   : > { %1671 = vsyncadd (%p1497_p6), %s1210_s14, 4294967168  ;;  %s19_s28 = sadd.s32 1, %s1702_s28   ;;  %s2039_s26 = sld [smem:[#allocation7_spill]] }
 0x9b4   : > { %p16_p7 = scmp.ge.s32.totalorder %s19_s28, 6   ;;  %s2040_s23 = sld [smem:[#allocation13_spill]] }
 0x9b5   : > { %s2041_s24 = sld [smem:[#allocation8_spill]]  ;;  %s2045_s21 = smov %s1678_s22 }
 0x9b6   : > { %s2042_s25 = sld [smem:[#allocation9_spill]] }
 0x9b7   : > { %s2043_s9 = sld [smem:[#allocation10_spill]] }
 0x9b8   : > { %s2044_s27 = sld [smem:[#allocation11_spill]] }
 0x9b9   : > { %s2046_s22 = smov %s2039_s26  ;;  %18 = sbr.rel (!%p16_p7) target bundleno = 5 (0x5), region = 98 }
 0x9bd   : > { %s2047_s26 = smov %s2043_s9 }
 0x9be   :  { %1215 = vsyncpa [#allocation4], 1 }
 0x9bf   :  { %1217 = vsyncpa [#allocation4 + $0x1], 1 }

</bundles_post_ra>
